<compile_context>
chip_gen: v7x
topology: tpu7x:2x2x1
jax: 0.10.0
libtpu: 0.0.40
codegen_flags: <defaults>
</compile_context>

<pallas_src>
import functools

import jax
import jax.numpy as jnp
from jax.experimental import pallas as pl
from jax.experimental.pallas import tpu as pltpu


def _round_up(v, m):
    return (v + m - 1) // m * m


def _gsa_kernel(xpos_ref, batch_ref, w1_ref, b1_ref, w2_ref, b2_ref, out_ref,
                *, num_batches):
    # Resident (B_rows, OUT_pad) accumulator per core: same output block for
    # every step along the reduction (arbitrary) axis.  Init also covers the
    # padding rows, which are never written again.
    @pl.when(pl.program_id(1) == 0)
    def _init():
        out_ref[...] = jnp.full(out_ref.shape, -jnp.inf, dtype=out_ref.dtype)

    # MLP: Linear -> ReLU -> Linear -> ReLU.
    # bf16 MXU operands (pre-cast in the wrapper), f32 accumulation; the
    # elementwise math stays f32.
    h = jnp.dot(xpos_ref[...], w1_ref[...],
                preferred_element_type=jnp.float32) + b1_ref[...]
    h = jnp.maximum(h, 0.0)
    f = jnp.dot(h.astype(jnp.bfloat16), w2_ref[...],
                preferred_element_type=jnp.float32) + b2_ref[...]
    f = jnp.maximum(f, 0.0)                          # (TILE_N, OUT_pad) f32

    # Per-tile segment max over the real segments only.  Padded tail rows of
    # the tile carry sentinel id -1 and never match any segment.
    bids = batch_ref[...]                            # (TILE_N, 1) int32
    rows = [jnp.max(jnp.where(bids == b, f, -jnp.inf), axis=0, keepdims=True)
            for b in range(num_batches)]             # static, small B
    tile_max = rows[0] if num_batches == 1 else jnp.concatenate(rows, axis=0)

    # Single sub-block store of the real rows (padding rows stay -inf).
    acc = out_ref[pl.ds(0, num_batches), :]
    out_ref[pl.ds(0, num_batches), :] = jnp.maximum(acc, tile_max)


def global_sa_module(x, pos, batch, params, num_batches, *, tile_n=2048,
                     num_cores=2):
    """PointNet++ GlobalSAModule forward.

    x: (N, C) f32, pos: (N, 3) f32, batch: (N,) int segment ids.
    params = (w1, b1, w2, b2) for nn = Lin(C+3, H) -> ReLU -> Lin(H, OUT) -> ReLU.
    Returns (pooled (B, OUT), pos_out (B, 3) zeros, batch_out arange(B)).
    """
    w1, b1, w2, b2 = params
    n, c = x.shape
    in_dim = c + 3
    hidden = w1.shape[1]
    out_dim = w2.shape[1]
    pos_dtype = pos.dtype

    # Lane-dense padded weights, pre-cast to bf16 (zero pads leave results
    # unchanged).  Biases stay f32 (added to the f32 accumulator).
    h_pad = _round_up(max(hidden, 128), 128)
    o_pad = _round_up(max(out_dim, 128), 128)
    w1p = jnp.zeros((in_dim, h_pad), jnp.bfloat16).at[:, :hidden].set(
        w1.astype(jnp.bfloat16))
    b1p = jnp.zeros((1, h_pad), jnp.float32).at[:, :hidden].set(
        b1.astype(jnp.float32).reshape(1, -1))
    w2p = jnp.zeros((h_pad, o_pad), jnp.bfloat16).at[:hidden, :out_dim].set(
        w2.astype(jnp.bfloat16))
    b2p = jnp.zeros((1, o_pad), jnp.float32).at[:, :out_dim].set(
        b2.astype(jnp.float32).reshape(1, -1))
    # NOTE: at large H/OUT on v7x, add pipeline_mode=pl.Buffered(1) to the
    # constant-index weight BlockSpecs so resident weights aren't double-buffered.

    # Packed (N, C+3) bf16 input: single K=C+3 matmul, single input DMA stream.
    xpos = jnp.concatenate([x.astype(jnp.float32), pos.astype(jnp.float32)],
                           axis=1).astype(jnp.bfloat16)

    # Tile over N (split across `num_cores` TensorCores); pad the tail with
    # sentinel segment id -1 so padding never contaminates the max.
    num_cores = max(1, int(num_cores))
    tile_n = max(8, min(tile_n, _round_up(n, 8)))
    tile_n = _round_up(tile_n, 8)
    n_pad = _round_up(n, num_cores * tile_n)
    batch = batch.astype(jnp.int32)
    if n_pad != n:
        xpos = jnp.pad(xpos, ((0, n_pad - n), (0, 0)))
        batch = jnp.pad(batch, (0, n_pad - n), constant_values=-1)
    batch2d = batch.reshape(-1, 1)

    b_rows = _round_up(max(num_batches, 8), 8)
    tiles_per_core = n_pad // (num_cores * tile_n)
    grid = (num_cores, tiles_per_core)

    def point_map(ci, ti):
        return (ci * tiles_per_core + ti, 0)

    cost = pl.CostEstimate(
        flops=2 * n_pad * (in_dim * h_pad + h_pad * o_pad),
        transcendentals=0,
        bytes_accessed=(n_pad * in_dim * 2                      # packed bf16 input
                        + n_pad * 4                             # batch ids
                        + (in_dim * h_pad + h_pad * o_pad) * 2  # bf16 weights
                        + (h_pad + o_pad) * 4                   # f32 biases
                        + num_cores * b_rows * o_pad * 4),      # per-core output
    )

    kernel = functools.partial(_gsa_kernel, num_batches=num_batches)
    pooled = pl.pallas_call(
        kernel,
        out_shape=jax.ShapeDtypeStruct((num_cores, b_rows, o_pad), jnp.float32),
        grid=grid,
        in_specs=[
            pl.BlockSpec((tile_n, in_dim), point_map),            # packed x||pos
            pl.BlockSpec((tile_n, 1), point_map),                 # batch ids
            pl.BlockSpec((in_dim, h_pad), lambda ci, ti: (0, 0)),  # w1 (resident)
            pl.BlockSpec((1, h_pad), lambda ci, ti: (0, 0)),       # b1 (resident)
            pl.BlockSpec((h_pad, o_pad), lambda ci, ti: (0, 0)),   # w2 (resident)
            pl.BlockSpec((1, o_pad), lambda ci, ti: (0, 0)),       # b2 (resident)
        ],
        out_specs=pl.BlockSpec((None, b_rows, o_pad), lambda ci, ti: (ci, 0, 0)),
        compiler_params=pltpu.CompilerParams(
            dimension_semantics=("parallel", "arbitrary"),  # cores x reduction
            vmem_limit_bytes=32 * 1024 * 1024,              # safe on v5e/v6e/v7x
        ),
        cost_estimate=cost,
    )(xpos, batch2d, w1p, b1p, w2p, b2p)

    # Combine per-core partial maxima, drop padding rows/lanes.
    pooled = jnp.max(pooled, axis=0)[:num_batches, :out_dim]
    pos_out = jnp.zeros((num_batches, 3), dtype=pos_dtype)
    batch_out = jnp.arange(num_batches, dtype=jnp.int32)
    return pooled, pos_out, batch_out


def _reference(x, pos, batch, params, num_batches):
    w1, b1, w2, b2 = params
    xcat = jnp.concatenate([x, pos], axis=1)
    h = jnp.maximum(xcat @ w1 + b1, 0.0)
    f = jnp.maximum(h @ w2 + b2, 0.0)
    pooled = jnp.stack([
        jnp.max(jnp.where((batch == b)[:, None], f, -jnp.inf), axis=0)
        for b in range(num_batches)
    ])
    return pooled


if __name__ == "__main__":
    # Small shapes consistent with the module's forward.
    N = 64          # total points across all clouds
    C = 5           # per-point feature channels
    B = 2           # number of point clouds (segments)
    HIDDEN = 32
    OUT = 128
    IN = C + 3      # concat([x, pos]) channel count

    key = jax.random.PRNGKey(0)
    kx, kp, kw1, kb1, kw2, kb2 = jax.random.split(key, 6)

    x = jax.random.normal(kx, (N, C), dtype=jnp.float32)
    pos = jax.random.normal(kp, (N, 3), dtype=jnp.float32)
    # sorted batch assignment: first half -> cloud 0, second half -> cloud 1
    batch = jnp.repeat(jnp.arange(B, dtype=jnp.int32), N // B)

    # Deterministic MLP parameters: Lin(IN,HIDDEN) -> ReLU -> Lin(HIDDEN,OUT) -> ReLU
    w1 = jax.random.normal(kw1, (IN, HIDDEN), dtype=jnp.float32) * 0.1
    b1 = jax.random.normal(kb1, (HIDDEN,), dtype=jnp.float32) * 0.1
    w2 = jax.random.normal(kw2, (HIDDEN, OUT), dtype=jnp.float32) * 0.1
    b2 = jax.random.normal(kb2, (OUT,), dtype=jnp.float32) * 0.1
    params = (w1, b1, w2, b2)

    # tile_n=48 with num_cores=2 -> grid (2, 1) over 96 padded rows: exercises
    # the per-core accumulators, the cross-core combine, a mixed-segment tile,
    # and the -1 sentinel tail masking.
    pooled, pos_out, batch_out = global_sa_module(x, pos, batch, params, B,
                                                  tile_n=48, num_cores=2)
    jax.block_until_ready((pooled, pos_out, batch_out))

    ref = _reference(x, pos, batch, params, B)
    assert pooled.shape == (B, OUT)
    assert pos_out.shape == (B, 3) and bool(jnp.all(pos_out == 0))
    assert batch_out.shape == (B,) and bool(
        jnp.all(batch_out == jnp.arange(B)))
    # bf16 matmul operands with f32 accumulation -> loosened tolerance.
    assert jnp.allclose(pooled, ref, atol=3e-2, rtol=3e-2), float(
        jnp.max(jnp.abs(pooled - ref)))

    print("KERNEL_OK")
</pallas_src>

<mosaic_0001>
module attributes {stable_mosaic.version = 11 : i64} {
  func.func @_gsa_kernel(%arg0: i32, %arg1: i32, %arg2: memref<48x8xbf16, #tpu.memory_space<vmem>>, %arg3: memref<48x1xi32, #tpu.memory_space<vmem>>, %arg4: memref<8x128xbf16, #tpu.memory_space<vmem>>, %arg5: memref<1x128xf32, #tpu.memory_space<vmem>>, %arg6: memref<128x128xbf16, #tpu.memory_space<vmem>>, %arg7: memref<1x128xf32, #tpu.memory_space<vmem>>, %arg8: memref<1x8x128xf32, #tpu.memory_space<vmem>>) attributes {dimension_semantics = [#tpu.dimension_semantics<parallel>, #tpu.dimension_semantics<arbitrary>], iteration_bounds = array<i64: 2, 1>, scalar_prefetch = 0 : i64, scratch_operands = 0 : i64, tpu.core_type = #tpu.core_type<tc>, window_params = [{transform_indices = @transform_0, window_bounds = array<i64: 48, 8>}, {transform_indices = @transform_1, window_bounds = array<i64: 48, 1>}, {pipeline_mode = #tpu.pipeline_mode<synchronous>, transform_indices = @transform_2, window_bounds = array<i64: 8, 128>}, {pipeline_mode = #tpu.pipeline_mode<synchronous>, transform_indices = @transform_3, window_bounds = array<i64: 1, 128>}, {pipeline_mode = #tpu.pipeline_mode<synchronous>, transform_indices = @transform_4, window_bounds = array<i64: 128, 128>}, {pipeline_mode = #tpu.pipeline_mode<synchronous>, transform_indices = @transform_5, window_bounds = array<i64: 1, 128>}, {transform_indices = @transform_6, window_bounds = array<i64: 1, 8, 128>}]} {
    %c0_i32 = arith.constant 0 : i32
    %0 = arith.cmpi eq, %arg1, %c0_i32 : i32
    %1 = arith.extui %0 : i1 to i32
    %c0_i32_0 = arith.constant 0 : i32
    %2 = arith.cmpi ne, %1, %c0_i32_0 : i32
    scf.if %2 {
      %cst_26 = arith.constant 0xFF800000 : f32
      %43 = vector.broadcast %cst_26 : f32 to vector<8x128xf32>
      %c0_27 = arith.constant 0 : index
      %c0_28 = arith.constant 0 : index
      %c0_29 = arith.constant 0 : index
      %44 = vector.load %arg8[%c0_27, %c0_28, %c0_29] : memref<1x8x128xf32, #tpu.memory_space<vmem>>, vector<1x8x128xf32>
      %45 = vector.shape_cast %44 : vector<1x8x128xf32> to vector<8x128xf32>
      %46 = vector.shape_cast %43 : vector<8x128xf32> to vector<1x8x128xf32>
      tpu.vector_store %arg8[%c0_27, %c0_28, %c0_29], %46 {strides = array<i32>} : memref<1x8x128xf32, #tpu.memory_space<vmem>>, vector<1x8x128xf32>,
    } else {
    }
    %c0 = arith.constant 0 : index
    %c0_1 = arith.constant 0 : index
    %3 = vector.load %arg2[%c0, %c0_1] : memref<48x8xbf16, #tpu.memory_space<vmem>>, vector<48x8xbf16>
    %c0_2 = arith.constant 0 : index
    %c0_3 = arith.constant 0 : index
    %4 = vector.load %arg4[%c0_2, %c0_3] : memref<8x128xbf16, #tpu.memory_space<vmem>>, vector<8x128xbf16>
    %cst = arith.constant dense<0.000000e+00> : vector<48x128xf32>
    %5 = tpu.matmul %3, %4, %cst {dimension_numbers = #tpu.dot_dimension_numbers<[1], [0], [0], [1], [0, 0, 1, 1], [], []>} : vector<48x8xbf16>, vector<8x128xbf16>, vector<48x128xf32> -> vector<48x128xf32>
    %c0_4 = arith.constant 0 : index
    %c0_5 = arith.constant 0 : index
    %6 = vector.load %arg5[%c0_4, %c0_5] : memref<1x128xf32, #tpu.memory_space<vmem>>, vector<1x128xf32>
    %7 = vector.broadcast %6 : vector<1x128xf32> to vector<48x128xf32>
    %8 = arith.addf %5, %7 : vector<48x128xf32>
    %cst_6 = arith.constant 0.000000e+00 : f32
    %9 = vector.broadcast %cst_6 : f32 to vector<48x128xf32>
    %10 = arith.maximumf %8, %9 : vector<48x128xf32>
    %11 = arith.truncf %10 : vector<48x128xf32> to vector<48x128xbf16>
    %c0_7 = arith.constant 0 : index
    %c0_8 = arith.constant 0 : index
    %12 = vector.load %arg6[%c0_7, %c0_8] : memref<128x128xbf16, #tpu.memory_space<vmem>>, vector<128x128xbf16>
    %cst_9 = arith.constant dense<0.000000e+00> : vector<48x128xf32>
    %13 = tpu.matmul %11, %12, %cst_9 {dimension_numbers = #tpu.dot_dimension_numbers<[1], [0], [0], [1], [0, 0, 1, 1], [], []>} : vector<48x128xbf16>, vector<128x128xbf16>, vector<48x128xf32> -> vector<48x128xf32>
    %c0_10 = arith.constant 0 : index
    %c0_11 = arith.constant 0 : index
    %14 = vector.load %arg7[%c0_10, %c0_11] : memref<1x128xf32, #tpu.memory_space<vmem>>, vector<1x128xf32>
    %15 = vector.broadcast %14 : vector<1x128xf32> to vector<48x128xf32>
    %16 = arith.addf %13, %15 : vector<48x128xf32>
    %cst_12 = arith.constant 0.000000e+00 : f32
    %17 = vector.broadcast %cst_12 : f32 to vector<48x128xf32>
    %18 = arith.maximumf %16, %17 : vector<48x128xf32>
    %c0_13 = arith.constant 0 : index
    %c0_14 = arith.constant 0 : index
    %19 = vector.load %arg3[%c0_13, %c0_14] : memref<48x1xi32, #tpu.memory_space<vmem>>, vector<48x1xi32>
    %c0_i32_15 = arith.constant 0 : i32
    %20 = vector.broadcast %c0_i32_15 : i32 to vector<48x1xi32>
    %21 = arith.cmpi eq, %19, %20 : vector<48x1xi32>
    %cst_16 = arith.constant 0xFF800000 : f32
    %22 = vector.shape_cast %21 : vector<48x1xi1> to vector<48x1xi1>
    %23 = vector.broadcast %22 : vector<48x1xi1> to vector<48x128xi1>
    %24 = vector.broadcast %cst_16 : f32 to vector<48x128xf32>
    %25 = arith.select %23, %18, %24 : vector<48x128xi1>, vector<48x128xf32>
    %cst_17 = arith.constant dense<0xFF800000> : vector<128xf32>
    %26 = vector.multi_reduction <maximumf>, %25, %cst_17 [0] : vector<48x128xf32> to vector<128xf32>
    %27 = vector.shape_cast %26 : vector<128xf32> to vector<1x128xf32>
    %c1_i32 = arith.constant 1 : i32
    %28 = vector.broadcast %c1_i32 : i32 to vector<48x1xi32>
    %29 = arith.cmpi eq, %19, %28 : vector<48x1xi32>
    %cst_18 = arith.constant 0xFF800000 : f32
    %30 = vector.shape_cast %29 : vector<48x1xi1> to vector<48x1xi1>
    %31 = vector.broadcast %30 : vector<48x1xi1> to vector<48x128xi1>
    %32 = vector.broadcast %cst_18 : f32 to vector<48x128xf32>
    %33 = arith.select %31, %18, %32 : vector<48x128xi1>, vector<48x128xf32>
    %cst_19 = arith.constant dense<0xFF800000> : vector<128xf32>
    %34 = vector.multi_reduction <maximumf>, %33, %cst_19 [0] : vector<48x128xf32> to vector<128xf32>
    %35 = vector.shape_cast %34 : vector<128xf32> to vector<1x128xf32>
    %36 = tpu.concatenate %27, %35 in 0 : vector<1x128xf32>, vector<1x128xf32> -> vector<2x128xf32>
    %c0_20 = arith.constant 0 : index
    %c0_21 = arith.constant 0 : index
    %c0_22 = arith.constant 0 : index
    %37 = vector.load %arg8[%c0_20, %c0_21, %c0_22] : memref<1x8x128xf32, #tpu.memory_space<vmem>>, vector<1x2x128xf32>
    %38 = vector.shape_cast %37 : vector<1x2x128xf32> to vector<2x128xf32>
    %39 = arith.maximumf %38, %36 : vector<2x128xf32>
    %c0_23 = arith.constant 0 : index
    %c0_24 = arith.constant 0 : index
    %c0_25 = arith.constant 0 : index
    %40 = vector.load %arg8[%c0_23, %c0_24, %c0_25] : memref<1x8x128xf32, #tpu.memory_space<vmem>>, vector<1x2x128xf32>
    %41 = vector.shape_cast %40 : vector<1x2x128xf32> to vector<2x128xf32>
    %42 = vector.shape_cast %39 : vector<2x128xf32> to vector<1x2x128xf32>
    tpu.vector_store %arg8[%c0_23, %c0_24, %c0_25], %42 {strides = array<i32>} : memref<1x8x128xf32, #tpu.memory_space<vmem>>, vector<1x2x128xf32>,
    return
  }
  func.func @transform_0(%arg0: i32, %arg1: i32) -> (i32, i32) {
    %c1_i32 = arith.constant 1 : i32
    %0 = arith.muli %arg0, %c1_i32 : i32
    %1 = arith.addi %0, %arg1 : i32
    %c0_i32 = arith.constant 0 : i32
    %c0_i32_0 = arith.constant 0 : i32
    return %1, %c0_i32 : i32, i32
  }
  func.func @transform_1(%arg0: i32, %arg1: i32) -> (i32, i32) {
    %c1_i32 = arith.constant 1 : i32
    %0 = arith.muli %arg0, %c1_i32 : i32
    %1 = arith.addi %0, %arg1 : i32
    %c0_i32 = arith.constant 0 : i32
    %c0_i32_0 = arith.constant 0 : i32
    return %1, %c0_i32 : i32, i32
  }
  func.func @transform_2(%arg0: i32, %arg1: i32) -> (i32, i32) {
    %c0_i32 = arith.constant 0 : i32
    %c0_i32_0 = arith.constant 0 : i32
    %c0_i32_1 = arith.constant 0 : i32
    return %c0_i32, %c0_i32_0 : i32, i32
  }
  func.func @transform_3(%arg0: i32, %arg1: i32) -> (i32, i32) {
    %c0_i32 = arith.constant 0 : i32
    %c0_i32_0 = arith.constant 0 : i32
    %c0_i32_1 = arith.constant 0 : i32
    return %c0_i32, %c0_i32_0 : i32, i32
  }
  func.func @transform_4(%arg0: i32, %arg1: i32) -> (i32, i32) {
    %c0_i32 = arith.constant 0 : i32
    %c0_i32_0 = arith.constant 0 : i32
    %c0_i32_1 = arith.constant 0 : i32
    return %c0_i32, %c0_i32_0 : i32, i32
  }
  func.func @transform_5(%arg0: i32, %arg1: i32) -> (i32, i32) {
    %c0_i32 = arith.constant 0 : i32
    %c0_i32_0 = arith.constant 0 : i32
    %c0_i32_1 = arith.constant 0 : i32
    return %c0_i32, %c0_i32_0 : i32, i32
  }
  func.func @transform_6(%arg0: i32, %arg1: i32) -> (i32, i32, i32) {
    %c0_i32 = arith.constant 0 : i32
    %c0_i32_0 = arith.constant 0 : i32
    %c0_i32_1 = arith.constant 0 : i32
    return %arg0, %c0_i32, %c0_i32_0 : i32, i32, i32
  }
}

</mosaic_0001>

<bundles_post_ra>
// kernel: tpu_custom_call.1
= control target key start
LH: loop header
LB: loop body
LE: loop exit
PB: predicated region body
PF: predicated region fallthrough
CT: control target
= control target key end

     0   :  { %11 = vsyncpa [#allocation3], 0  ;;  %s1245_s0 = inlined_call_operand.vmem [shape: bf16[96,8], index: 0, kind: input, shape index: {}]   ;;  %s1246_s1 = inlined_call_operand.vmem [shape: s32[96,1], index: 1, kind: input, shape index: {}]   ;;  %s1247_s2 = inlined_call_operand.vmem [shape: bf16[8,128], index: 2, kind: input, shape index: {}]   ;;  %s1248_s3 = inlined_call_operand.vmem [shape: f32[1,128], index: 3, kind: input, shape index: {}]   ;;  %s1249_s4 = inlined_call_operand.vmem [shape: bf16[128,128], index: 4, kind: input, shape index: {}]   ;;  %s1250_s5 = inlined_call_operand.vmem [shape: f32[1,128], index: 5, kind: input, shape index: {}]   ;;  %s1251_s6 = inlined_call_operand.hbm [shape: f32[2,8,128], index: 6, kind: output, shape index: {}]  }
   0x1   :  { %13 = vsyncpa [#allocation3 + $0x1], 0  ;;  %s1052_s21 = smov 0   ;;  %s1054_s22 = smov 0  }
   0x2   :  { %s1056_s23 = smov 0   ;;  %s1058_s24 = smov 0  }
   0x3   :  { %s1060_s25 = smov 0   ;;  %s1062_s26 = smov 0  }
   0x4 LB: > { %s759_s27 = sadd.s32 4294967295, %s1010_s26   ;;  %s760_s28 = sadd.s32 4294967294, %s1010_s26   ;;  %s1010_s26 = sphi %s1062_s26, %s19_s26   ;;  %s1006_s25 = sphi %s1060_s25, %s1258_s25   ;;  %s1002_s24 = sphi %s1058_s24, %s1257_s24   ;;  %s998_s23 = sphi %s1056_s23, %s1256_s23   ;;  %s994_s22 = sphi %s1054_s22, %s1255_s22   ;;  %s990_s21 = sphi %s1052_s21, %s1254_s21  }
   0x5   : > { %s31_s29 = sadd.s32 1, %s1006_s25  ;;  %s178_s30 = sadd.s32 1, %s998_s23 }
   0x6   : > { %p33_p0 = scmp.ge.s32.totalorder %s31_s29, 2  ;;  %p188_p1 = scmp.ne.s32.totalorder %s998_s23, %s994_s22 }
   0x7   : > { %p189_p2 = scmp.eq.s32.totalorder %s759_s27, 1  ;;  %p194_p3 = scmp.ne.s32.totalorder %s994_s22, %s990_s21 }
   0x8   : > { %s1260_s29 = smov (%p33_p0, %s31_s29), 0  ;;  %p195_p5 = scmp.eq.s32.totalorder %s760_s28, 1 }
   0x9   : > { %p1092_p4 = por %p189_p2, %p188_p1  ;;  %s175_s8 = ssub.s32 %s1006_s25, %s1260_s29 }
   0xa   : > { %p763_p6 = scmp.ge.s32.totalorder %s1010_s26, 1  ;;  %p176_p7 = scmp.eq.s32.totalorder %s175_s8, 0 }
   0xb   : > { %p1099_p8 = por %p195_p5, %p194_p3  ;;  %p247_p9 = scmp.lt.s32.totalorder %s1010_s26, 3 }
   0xc   : > { %s1105_s10 = scalar_select %p176_p7, %s998_s23, %s178_s30  }
   0xd   : > { %p248_p10 = pnand %p763_p6, %p247_p9 }
   0xe   : > { %v312_v0 = vld [vmem:[%s1247_s2] sm:$0xf] (!%p248_p10)  ;;  %vm345_vm0 = vcmask (!%p248_p10), 1043456   ;;  %s285_s13 = smul.u32 (!%p248_p10), 6, %s1002_s24  ;;  %v1012_v1 = vmov (!%p248_p10), 0.0   ;;  %vm1013_vm1 = vmmov (!%p248_p10), 0  }
   0xf   : > { %251 = sbr.rel (%p248_p10) target bundleno = 516 (0x204), region = 44  ;;  %802 = vmatprep.subr.bf16.mxu0 (!%p248_p10), %v1012_v1  ;;  %v347_v2 = vsel (!%p248_p10), %vm345_vm0, %v312_v0, 0  ;;  %804 = vmatprep.mubr.msk.bf16.mxu0 (!%p248_p10), %vm1013_vm1, %v1012_v1  ;;  %v924_v3 = vld [vmem:[%s1249_s4] sm:$0xff] (!%p248_p10)   ;;  %v925_v4 = vld [vmem:[%s1249_s4 + $0x8] sm:$0xff] (!%p248_p10)   ;;  %vm335_vm2 = vcmask (!%p248_p10), 64512   ;;  %v926_v6 = vld [vmem:[%s1249_s4 + $0x10] sm:$0xff] (!%p248_p10)  }
  0x10   : > { %803 = vmatpush3.bf16.msra.mxu0 (!%p248_p10), %v347_v2  ;;  %p286_p11 = scmp.lt.s32.totalorder (!%p248_p10), %s285_s13, 11  ;;  %844 = vmatprep.subr.bf16.mxu1 (!%p248_p10), %v1012_v1  ;;  %v927_v8 = vld [vmem:[%s1249_s4 + $0x18] sm:$0xff] (!%p248_p10)   ;;  %v928_v9 = vld [vmem:[%s1249_s4 + $0x20] sm:$0xff] (!%p248_p10)   ;;  %v929_v11 = vld [vmem:[%s1249_s4 + $0x28] sm:$0xff] (!%p248_p10)   ;;  %v1014_v14 = vmov (!%p248_p10), 0   ;;  %s281_s12 = sand.u32 (!%p248_p10), 1, %s994_s22  }
  0x11   : > { %816 = vmatprep.subr.bf16.mxu0 (!%p248_p10), %v1012_v1  ;;  %836 = vmatprep.mubr.msk.bf16.mxu1 (!%p248_p10), %vm1013_vm1, %v1012_v1  ;;  %v930_v12 = vld [vmem:[%s1249_s4 + $0x30] sm:$0xff] (!%p248_p10)   ;;  %v931_v13 = vld [vmem:[%s1249_s4 + $0x38] sm:$0xff] (!%p248_p10)   ;;  %v767_v33 = vld [vmem:[%s1248_s3] ss:$0 sm:$0xff] (!%p248_p10)  ;;  %s764_s14 = sshll.u32 (!%p248_p10), %s281_s12, 3  ;;  %v1015_v61 = vmov (!%p248_p10), -inf  }
  0x12   : > { %852 = vmatpush3.bf16.msra.mxu1 (!%p248_p10), %v924_v3  ;;  %920 = vset.pattern.permute.xlu1 (!%p248_p10), %v1014_v14  ;;  %s1183_s15 = scalar_lea.vmem (!%p248_p10), [#allocation2], %s764_s14  ;;  %s784_s18 = sshll.u32 (!%p248_p10), %s1002_s24, 7 }
  0x13   : > { %845 = vmatprep.subr.bf16.mxu1 (!%p248_p10), %v1012_v1  ;;  %919 = vset.pattern.permute.xlu0 (!%p248_p10), %v1014_v14  ;;  %305 = vst [vmem:[%s1183_s15] sm:$0xff] (!%p248_p10), %v1015_v61  ;;  %s680_s19 = sshll.u32 (!%p248_p10), %s1183_s15, 4  ;;  %s1195_s28 = scalar_lea.hbm (!%p248_p10), %s1251_s6, %s784_s18  ;;  %s1197_s19 = int_to_ptr.vmem [resolvable:$true] %s680_s19 }
  0x14   : > { %s667_s30 = scalar_lea.sflag (!%p248_p10), [#allocation3], %s281_s12  ;;  %s1016_s24 = smov (!%p248_p10), [#allocation2]  }
  0x16   : > { %s1262_s13 = smov (!%p286_p11, %s285_s13), 11  ;;  %853 = vmatpush3.bf16.msra.mxu1 %v925_v4 }
  0x17   : > { %s765_s16 = sshll.u32 %s1262_s13, 2  ;;  %846 = vmatprep.subr.bf16.mxu1 %v1012_v1 }
  0x18   : > { %s289_s27 = scalar_lea.vmem %s1245_s0, %s765_s16 }
  0x19   : > { %v921_v5 = vld [vmem:[%s289_s27] sm:$0xff]   ;;  %v922_v7 = vld [vmem:[%s289_s27 + $0x8] sm:$0xff]   ;;  %v923_v10 = vld [vmem:[%s289_s27 + $0x10] sm:$0xff]   ;;  %s766_s27 = sshll.u32 %s1262_s13, 3  ;;  %s936_s13 = sshll.u32 %s1016_s24, 4  ;;  %s937_s13 = int_to_ptr.vmem [resolvable:$false] %s936_s13 }
  0x1a   : > { %805 = vmatmul.mubr.msk.bf16.vlgmr.msra.gmra.mrb[0].mxu0 %vm335_vm2, %v921_v5  ;;  %854 = vmatpush3.bf16.msra.mxu1 %v926_v6  ;;  %s297_s8 = scalar_lea.vmem %s1246_s1, %s766_s27  ;;  %s938_s11 = scalar_lea.vmem %s937_s13, 256 }
  0x1b   : > { %808 = vmatprep.mubr.msk.bf16.mxu0 %vm1013_vm1, %v1012_v1  ;;  %817 = vmatpush3.bf16.msra.mxu0 %v924_v3  ;;  %v553_v15 = vld [vmem:[%s297_s8 + $0x20] sm:$0xff]  ;;  %v554_v17 = vld [vmem:[%s297_s8 + $0x28] sm:$0xff]  ;;  %v552_v25 = vld [vmem:[%s297_s8 + $0x18] sm:$0xff]  ;;  %p939_p1 = scmp.lt.s32.totalorder %s1197_s19, %s937_s13 }
  0x1c   : > { %818 = vmatprep.subr.bf16.mxu0 %v1012_v1  ;;  %847 = vmatprep.subr.bf16.mxu1 %v1012_v1  ;;  %v549_v16 = vld [vmem:[%s297_s8] sm:$0xff]  ;;  %vm559_vm3 = vcmp.eq.s32.totalorder %v553_v15, 0  ;;  %vm560_vm5 = vcmp.eq.s32.totalorder %v554_v17, 0  ;;  %v550_v18 = vld [vmem:[%s297_s8 + $0x8] sm:$0xff]  ;;  %vm613_vm9 = vcmp.eq.s32.totalorder %v554_v17, 1  ;;  %vm612_vm10 = vcmp.eq.s32.totalorder %v553_v15, 1 }
  0x1d   : > { %vm555_vm4 = vcmp.eq.s32.totalorder %v549_v16, 0  ;;  %v565_v19 = vsel %vm559_vm3, 1, %v1014_v14  ;;  %vm556_vm6 = vcmp.eq.s32.totalorder %v550_v18, 0  ;;  %v566_v21 = vsel %vm560_vm5, 1, %v1014_v14  ;;  %v551_v26 = vld [vmem:[%s297_s8 + $0x10] sm:$0xff]  ;;  %s932_s8 = scalar_lea.vmem %s1197_s19, 128 }
  0x1e   : > { %855 = vmatpush3.bf16.msra.mxu1 %v927_v8  ;;  %v561_v20 = vsel %vm555_vm4, 1, %v1014_v14  ;;  %580 = vperm.xlu1 %920, %v565_v19   ;;  %v562_v22 = vsel %vm556_vm6, 1, %v1014_v14  ;;  %vm609_vm7 = vcmp.eq.s32.totalorder %v550_v18, 1  ;;  %vm608_vm8 = vcmp.eq.s32.totalorder %v549_v16, 1  ;;  %p933_p12 = scmp.ne.s32.totalorder %s1197_s19, %s932_s8  ;;  %p940_p2 = scmp.lt.s32.totalorder %s938_s11, %s932_s8 }
  0x1f   : > { %819 = vmatpush3.bf16.msra.mxu0 %v925_v4  ;;  %848 = vmatprep.subr.bf16.mxu1 %v1012_v1  ;;  %v615_v23 = vsel %vm609_vm7, 1, %v1014_v14  ;;  %v614_v24 = vsel %vm608_vm8, 1, %v1014_v14  ;;  %v619_v27 = vsel %vm613_vm9, 1, %v1014_v14  ;;  %v618_v28 = vsel %vm612_vm10, 1, %v1014_v14 }
  0x20   : > { %820 = vmatprep.subr.bf16.mxu0 %v1012_v1  ;;  %568 = vperm.xlu0 %919, %v561_v20   ;;  %vm558_vm11 = vcmp.eq.s32.totalorder %v552_v25, 0  ;;  %vm557_vm12 = vcmp.eq.s32.totalorder %v551_v26, 0  ;;  %vm611_vm13 = vcmp.eq.s32.totalorder %v552_v25, 1  ;;  %vm610_vm14 = vcmp.eq.s32.totalorder %v551_v26, 1  ;;  %p934_p13 = pnand %p933_p12, %p1092_p4  ;;  %p941_p3 = por %p940_p2, %p939_p1 }
  0x21   : > { %v564_v29 = vsel %vm558_vm11, 1, %v1014_v14  ;;  %v563_v30 = vsel %vm557_vm12, 1, %v1014_v14  ;;  %v617_v31 = vsel %vm611_vm13, 1, %v1014_v14  ;;  %v616_v32 = vsel %vm610_vm14, 1, %v1014_v14 }
  0x22   : > { %809 = vmatmul.mubr.msk.bf16.gmra.mrb[4].mxu0 %vm335_vm2, %v922_v7  ;;  %856 = vmatpush3.bf16.msra.mxu1 %v928_v9  ;;  %vm661_vm11 = vcmask 1040384   ;;  %p935_p0 = pneg %p934_p13 }
  0x23   : > { %812 = vmatprep.mubr.msk.bf16.mxu0 %vm1013_vm1, %v1012_v1  ;;  %821 = vmatpush3.bf16.msra.mxu0 %v926_v6 }
  0x24   : > { %822 = vmatprep.subr.bf16.mxu0 %v1012_v1  ;;  %849 = vmatprep.subr.bf16.mxu1 %v1012_v1  ;;  %p942_p5 = pnand %p941_p3, %p935_p0 }
  0x25   : > { %583 = vperm.xlu1 %920, %v566_v21   ;;  %571 = vperm.xlu0 %919, %v562_v22  }
  0x26   : > { %857 = vmatpush3.bf16.msra.mxu1 %v929_v11 }
  0x27   : > { %823 = vmatpush3.bf16.msra.mxu0 %v927_v8  ;;  %850 = vmatprep.subr.bf16.mxu1 %v1012_v1 }
  0x28   : > { %824 = vmatprep.subr.bf16.mxu0 %v1012_v1 }
  0x29   : > { %624 = vperm.xlu1 %920, %v615_v23   ;;  %621 = vperm.xlu0 %919, %v614_v24  }
  0x2a   : > { %813 = vmatmul.mubr.msk.bf16.gmra.mrb[8].mxu0 %vm335_vm2, %v923_v10  ;;  %858 = vmatpush3.bf16.msra.mxu1 %v930_v12 }
  0x2b   : > { %825 = vmatpush3.bf16.msra.mxu0 %v928_v9  ;;  %832 = vmatprep.mubr.msk.bf16.mxu0 %vm1013_vm1, %v1012_v1 }
  0x2c   : > { %826 = vmatprep.subr.bf16.mxu0 %v1012_v1  ;;  %851 = vmatprep.subr.bf16.mxu1 %v1012_v1 }
  0x2d   : > { %636 = vperm.xlu1 %920, %v619_v27   ;;  %633 = vperm.xlu0 %919, %v618_v28  }
  0x2e   : > { %859 = vmatpush3.bf16.msra.mxu1 %v931_v13 }
  0x2f   : > { %827 = vmatpush3.bf16.msra.mxu0 %v929_v11 }
  0x30   : > { %828 = vmatprep.subr.bf16.mxu0 %v1012_v1 }
  0x31   : > { %577 = vperm.xlu1 %920, %v564_v29   ;;  %574 = vperm.xlu0 %919, %v563_v30  }
  0x33   : > { %829 = vmatpush3.bf16.msra.mxu0 %v930_v12  ;;  %v774_v12 = vld [vmem:[%s1250_s5] ss:$0 sm:$0xff] }
  0x34   : > { %830 = vmatprep.subr.bf16.mxu0 %v1012_v1 }
  0x35   : > { %630 = vperm.xlu1 %920, %v617_v31   ;;  %627 = vperm.xlu0 %919, %v616_v32  }
  0x37   : > { %831 = vmatpush3.bf16.msra.mxu0 %v931_v13 }
  0x9d   : > { %v581_v62 = vpop.permute.xlu1 %580 }
  0x9e   : > { %vm589_vm5 = vcmp.eq.s32.totalorder %v581_v62, 1 }
  0x9f   : > { %v569_v63 = vpop.permute.xlu0 %568 }
  0xa0   : > { %vm585_vm3 = vcmp.eq.s32.totalorder %v569_v63, 1 }
  0xa4   : > { %v584_v0 = vpop.permute.xlu1 %583  ;;  %v572_v2 = vpop.permute.xlu0 %571 }
  0xa5   : > { %vm590_vm6 = vcmp.eq.s32.totalorder %v584_v0, 1  ;;  %vm586_vm7 = vcmp.eq.s32.totalorder %v572_v2, 1 }
  0xa8   : > { %v625_v3 = vpop.permute.xlu1 %624 }
  0xa9   : > { %vm639_vm9 = vcmp.eq.s32.totalorder %v625_v3, 1 }
  0xac   : > { %v637_v4 = vpop.permute.xlu1 %636 }
  0xad   : > { %vm643_vm10 = vcmp.eq.s32.totalorder %v637_v4, 1 }
  0xb0   : > { %v578_v10 = vpop.permute.xlu1 %577 }
  0xb1   : > { %vm588_vm15 = vcmp.eq.s32.totalorder %v578_v10, 1 }
  0xb4   : > { %v631_v16 = vpop.permute.xlu1 %630 }
  0xed   : > { %v383_v34 = vpop.f32.mrb[0].mxu0 }
  0xee   : > { %v384_v35 = vadd.f32 %v767_v33, %v383_v34  ;;  %v806_v36 = vpop.f32.mrb[1].mxu0 }
  0xef   : > { %v386_v37 = vpop.f32.mrb[2].mxu0 }
  0xf0   : > { %v387_v38 = vadd.f32 %v767_v33, %v386_v37  ;;  %v807_v39 = vpop.f32.mrb[3].mxu0  ;;  %v406_v40 = vmax.f32 %v384_v35, 0.0 }
  0xf2   : > { %v407_v41 = vmax.f32 %v387_v38, 0.0 }
  0xf4   : > { %v412_v42 = vpack.c.bf16 %v407_v41, %v406_v40 }
  0xf5   : > { %v391_v43 = vpop.f32.mrb[4].mxu0 }
  0xf6   : > { %v392_v44 = vadd.f32 %v767_v33, %v391_v43  ;;  %v810_v45 = vpop.f32.mrb[5].mxu0  ;;  %833 = vmatmul.mubr.bf16.vlgmr.msra.gmra.mrb[12].mxu0 %v412_v42 }
  0xf7   : > { %v394_v46 = vpop.f32.mrb[6].mxu0 }
  0xf8   : > { %v395_v47 = vadd.f32 %v767_v33, %v394_v46  ;;  %v811_v48 = vpop.f32.mrb[7].mxu0  ;;  %v408_v49 = vmax.f32 %v392_v44, 0.0 }
  0xfa   : > { %v409_v50 = vmax.f32 %v395_v47, 0.0 }
  0xfc   : > { %v413_v51 = vpack.c.bf16 %v409_v50, %v408_v49 }
  0xfd   : > { %v399_v52 = vpop.f32.mrb[8].mxu0 }
  0xfe   : > { %v400_v53 = vadd.f32 %v767_v33, %v399_v52  ;;  %v814_v54 = vpop.f32.mrb[9].mxu0  ;;  %837 = vmatmul.mubr.bf16.vlgmr.msra.gmra.mrb[0].mxu1 %v413_v51 }
  0xff   : > { %v402_v55 = vpop.f32.mrb[10].mxu0  ;;  %840 = vmatprep.mubr.msk.bf16.mxu1 %vm1013_vm1, %v1012_v1  ;;  %v622_v1 = vpop.permute.xlu0 %621  ;;  %vm641_vm1 = vcmp.eq.s32.totalorder %v631_v16, 1 }
 0x100   : > { %v403_v56 = vadd.f32 %v767_v33, %v402_v55  ;;  %v815_v57 = vpop.f32.mrb[11].mxu0  ;;  %v410_v58 = vmax.f32 %v400_v53, 0.0  ;;  %vm638_vm4 = vcmp.eq.s32.totalorder %v622_v1, 1 }
 0x102   : > { %v411_v59 = vmax.f32 %v403_v56, 0.0 }
 0x103   : > { %v634_v5 = vpop.permute.xlu0 %633 }
 0x104   : > { %v414_v60 = vpack.c.bf16 %v411_v59, %v410_v58  ;;  %vm642_vm8 = vcmp.eq.s32.totalorder %v634_v5, 1  ;;  %v663_v5 = vld [vmem:[%s1183_s15] sm:$0x3] }
 0x106   : > { %841 = vmatmul.mubr.bf16.gmra.mrb[4].mxu1 %v414_v60 }
 0x107   : > { %v575_v11 = vpop.permute.xlu0 %574 }
 0x108   : > { %vm587_vm0 = vcmp.eq.s32.totalorder %v575_v11, 1 }
 0x10b   : > { %v628_v18 = vpop.permute.xlu0 %627 }
 0x10c   : > { %vm640_vm2 = vcmp.eq.s32.totalorder %v628_v18, 1 }
 0x1c9   : > { %v520_v6 = vpop.f32.mrb[12].mxu0 }
 0x1ca   : > { %v834_v7 = vpop.f32.mrb[13].mxu0  ;;  %v521_v22 = vadd.f32 %v774_v12, %v520_v6 }
 0x1cb   : > { %v523_v8 = vpop.f32.mrb[14].mxu0 }
 0x1cc   : > { %v835_v9 = vpop.f32.mrb[15].mxu0  ;;  %v524_v24 = vadd.f32 %v774_v12, %v523_v8  ;;  %v543_v29 = vmax.f32 %v521_v22, 0.0 }
 0x1ce   : > { %v544_v36 = vmax.f32 %v524_v24, 0.0  ;;  %v591_v40 = vsel %vm585_vm3, %v543_v29, -inf  ;;  %v644_v41 = vsel %vm638_vm4, %v543_v29, -inf }
 0x1d0   : > { %v592_v47 = vsel %vm586_vm7, %v544_v36, -inf  ;;  %v645_v48 = vsel %vm639_vm9, %v544_v36, -inf }
 0x1d1   : > { %v528_v13 = vpop.f32.mrb[0].mxu1 }
 0x1d2   : > { %v529_v14 = vadd.f32 %v774_v12, %v528_v13  ;;  %v838_v15 = vpop.f32.mrb[1].mxu1 }
 0x1d3   : > { %v531_v17 = vpop.f32.mrb[2].mxu1 }
 0x1d4   : > { %v545_v19 = vmax.f32 %v529_v14, 0.0  ;;  %v532_v20 = vadd.f32 %v774_v12, %v531_v17  ;;  %v839_v21 = vpop.f32.mrb[3].mxu1 }
 0x1d6   : > { %v546_v23 = vmax.f32 %v532_v20, 0.0  ;;  %v593_v25 = vsel %vm587_vm0, %v545_v19, -inf  ;;  %v646_v26 = vsel %vm640_vm2, %v545_v19, -inf }
 0x1d8   : > { %v594_v27 = vsel %vm588_vm15, %v546_v23, -inf  ;;  %v647_v28 = vsel %vm641_vm1, %v546_v23, -inf }
 0x1d9   : > { %v600_v30 = vmax.f32 %v593_v25, %v594_v27  ;;  %v653_v31 = vmax.f32 %v646_v26, %v647_v28  ;;  %v536_v32 = vpop.f32.mrb[4].mxu1 }
 0x1da   : > { %v537_v33 = vadd.f32 %v774_v12, %v536_v32  ;;  %v842_v34 = vpop.f32.mrb[5].mxu1 }
 0x1db   : > { %v539_v35 = vpop.f32.mrb[6].mxu1 }
 0x1dc   : > { %v547_v37 = vmax.f32 %v537_v33, 0.0  ;;  %v540_v38 = vadd.f32 %v774_v12, %v539_v35  ;;  %v843_v39 = vpop.f32.mrb[7].mxu1 }
 0x1de   : > { %v595_v42 = vsel %vm589_vm5, %v547_v37, -inf  ;;  %v648_v43 = vsel %vm642_vm8, %v547_v37, -inf  ;;  %v548_v44 = vmax.f32 %v540_v38, 0.0 }
 0x1df   : > { %v597_v45 = vmax.f32 %v591_v40, %v595_v42  ;;  %v650_v46 = vmax.f32 %v644_v41, %v648_v43 }
 0x1e0   : > { %v596_v49 = vsel %vm590_vm6, %v548_v44, -inf  ;;  %v649_v50 = vsel %vm643_vm10, %v548_v44, -inf }
 0x1e1   : > { %v598_v51 = vmax.f32 %v592_v47, %v596_v49  ;;  %v651_v52 = vmax.f32 %v645_v48, %v649_v50 }
 0x1e3   : > { %v599_v53 = vmax.f32 %v597_v45, %v598_v51  ;;  %v652_v54 = vmax.f32 %v650_v46, %v651_v52 }
 0x1e5   : > { %v601_v55 = vmax.f32 %v599_v53, %v600_v30  ;;  %v654_v56 = vmax.f32 %v652_v54, %v653_v31 }
 0x1e7   : > { %v602_v57 = vrot.slane %v601_v55, 4  ;;  %v655_v58 = vrot.slane %v654_v56, 4 }
 0x1e9   : > { %v603_v59 = vmax.f32 %v601_v55, %v602_v57  ;;  %v656_v60 = vmax.f32 %v654_v56, %v655_v58 }
 0x1eb   : > { %v604_v61 = vrot.slane %v603_v59, 2  ;;  %v657_v62 = vrot.slane %v656_v60, 2 }
 0x1ed   : > { %v605_v63 = vmax.f32 %v603_v59, %v604_v61  ;;  %v658_v0 = vmax.f32 %v656_v60, %v657_v62 }
 0x1ef   : > { %v606_v2 = vrot.slane %v605_v63, 1  ;;  %v659_v3 = vrot.slane %v658_v0, 1 }
 0x1f1   : > { %v607_v1 = vmax.f32 %v605_v63, %v606_v2  ;;  %v660_v4 = vmax.f32 %v658_v0, %v659_v3 }
 0x1f3   : > { %v662_v6 = vsel %vm661_vm11, %v607_v1, %v660_v4 }
 0x1f4   : > { %v664_v7 = vmax.f32 %v663_v5, %v662_v6 }
 0x1f6   : > { %665 = vst [vmem:[%s1183_s15] sm:$0x3] %v664_v7 }
 0x1f7   : > { %945 = shalt.err (!%p942_p5)
}
 0x1f8   : > { %s946_s12 = scalar_lea.hbm %s1195_s28, 128  ;;  %s950_s16 = scalar_lea.hbm %s1251_s6, 256 }
 0x1f9   : > { %p947_p6 = scmp.ne.s32.totalorder %s1195_s28, %s946_s12  ;;  %p951_p10 = scmp.lt.u32.totalorder %s1195_s28, %s1251_s6 }
 0x1fa   : > { %p952_p11 = scmp.lt.u32.totalorder %s950_s16, %s946_s12  ;;  %p954_p13 = scmp.lt.u32.totalorder %s946_s12, %s1195_s28 }
 0x1fb   : > { %p948_p7 = pnand %p947_p6, %p1092_p4 }
 0x1fc   : > { %p953_p12 = por %p952_p11, %p951_p10 }
 0x1fd   : > { %p949_p9 = pneg %p948_p7 }
 0x1fe   : > { %p955_p0 = por %p954_p13, %p953_p12 }
 0x200   : > { %p956_p1 = pnand %p955_p0, %p949_p9 }
 0x202   : > { %959 = shalt.err (!%p956_p1)
}
 0x203   : > { %860 = dma.vmem_to_hbm [thread:$0]  (%p1092_p4), %s1197_s19, 128, %s1195_s28, %s667_s30  }
 0x204 PF: > { %p866_p2 = scmp.ge.s32.totalorder %s1010_s26, 2  ;;  %s692_s20 = sand.u32 1, %s990_s21  }
 0x205   : > { %s693_s27 = scalar_lea.sflag [#allocation3], %s692_s20 }
 0x206   : > { %p863_p3 = pnand %p866_p2, %p1099_p8 }
 0x208   : > { %985 = dma.done.wait (!%p863_p3), %s693_s27, 128  }
 0x209   : > { %987 = vsyncadd (!%p863_p3), %s693_s27, 4294967168  ;;  %s19_s26 = sadd.s32 1, %s1010_s26   ;;  %s1254_s21 = smov %s994_s22 }
 0x20a   : > { %p16_p5 = scmp.ge.s32.totalorder %s19_s26, 4   ;;  %s1255_s22 = smov %s998_s23 }
 0x20b   : > { %s1256_s23 = smov %s1105_s10  ;;  %s1257_s24 = smov %s1006_s25 }
 0x20c   : > { %s1258_s25 = smov %s1260_s29  ;;  %18 = sbr.rel (!%p16_p5) target bundleno = 4 (0x4), region = 86 }
 0x213   :  { %698 = vsyncpa [#allocation3], 1 }
 0x214   :  { %700 = vsyncpa [#allocation3 + $0x1], 1 }

</bundles_post_ra>
